<compile_context>
chip_gen: v5e
topology: v5e:2x2
jax: 0.10.0
libtpu: 0.0.40
codegen_flags: <defaults>
</compile_context>

<pallas_src>
import jax
import jax.numpy as jnp
import numpy as np
from jax.experimental import pallas as pl
from jax.experimental.pallas import tpu as pltpu


# ----------------------------------------------------------------------------
# Bicubic interpolation matrices (PyTorch semantics: A=-0.75, align_corners=False,
# border replication).  Host-side, built once.
# ----------------------------------------------------------------------------
def _cubic_coeffs(t, A=-0.75):
    def c1(x):
        return ((A + 2.0) * x - (A + 3.0)) * x * x + 1.0

    def c2(x):
        return ((A * x - 5.0 * A) * x + 8.0 * A) * x - 4.0 * A

    return [c2(t + 1.0), c1(t), c1(1.0 - t), c2(2.0 - t)]


def bicubic_matrix(n_in, scale):
    # TODO(synk): integer scale factors only (matches the module's scale_factor=(4, 3)).
    n_out = n_in * scale
    M = np.zeros((n_out, n_in), dtype=np.float64)
    for i in range(n_out):
        src = (i + 0.5) / scale - 0.5
        i0 = int(np.floor(src))
        t = src - i0
        coeffs = _cubic_coeffs(t)
        for k in range(4):
            idx = min(max(i0 - 1 + k, 0), n_in - 1)
            M[i, idx] += coeffs[k]
    # Every row must sum to exactly 1 (partition of unity under border replication);
    # the per-channel affine + bias fold in the wrapper relies on this.
    assert np.allclose(M.sum(axis=1), 1.0, atol=1e-12)
    return M.astype(np.float32)


# ----------------------------------------------------------------------------
# Pallas kernel: one block = b_tile batch elements, fully row-merged / lane-dense.
#   x_ref    : (b_tile*C_in,  H*W)  f32   HR model input rows
#   e_ref    : (b_tile*C_out, h*w)  f32   LR estimate rows
#   wbig_ref : (b_tile*C_out, b_tile*C_in) f32   kron(I_btile, conv_weight)
#   p_ref    : (b_tile*C_out, 8)    f32   packed per-row params [a, b_folded, ...]
#   kt_ref   : (h*w, H*W)           bf16  kron(wh, ww)^T bicubic resize matrix
#   out_ref  : (b_tile*C_out, H*W)  f32
# ----------------------------------------------------------------------------
def residual_output_kernel(x_ref, e_ref, wbig_ref, p_ref, kt_ref, out_ref):
    p = p_ref[...]
    a = p[:, 0:1]                                 # folded scale  = s_hr / s_lr
    b = p[:, 1:2]                                 # folded offset = (o_hr - o_lr*a) + conv_bias

    # LR-revert + HR-apply + conv-bias folded into ONE affine on the SMALL tensor (f32 VPU).
    e_aff = e_ref[...] * a + b                    # (R, hw)

    # Bicubic (4, 3) upsample: ONE lane-dense MXU matmul, bf16 operands, f32 accumulation.
    acc = jnp.dot(e_aff.astype(jnp.bfloat16), kt_ref[...],
                  preferred_element_type=jnp.float32)           # (R, HW)

    # Residual 1x1 conv: block-diagonal kron(I, W) @ x — single matmul, tiny K, f32.
    acc = acc + jnp.dot(wbig_ref[...], x_ref[...],
                        preferred_element_type=jnp.float32)     # (R, HW)

    out_ref[...] = acc.astype(out_ref.dtype)


# ----------------------------------------------------------------------------
# Generation-aware tiling helpers.
# ----------------------------------------------------------------------------
def _tpu_info():
    """(physical VMEM bytes, #TensorCores per chip) with conservative fallbacks."""
    vmem = 64 << 20                       # conservative default (v7x per-TC VMEM)
    try:
        info = pltpu.get_tpu_info()
        for name in ("vmem_capacity_bytes", "vmem_bytes", "vmem_size_bytes"):
            v = getattr(info, name, None)
            if isinstance(v, (int, np.integer)) and int(v) > 0:
                vmem = int(v)
                break
    except Exception:
        pass
    cores = 1
    try:
        kind = jax.devices()[0].device_kind.lower()
        if "v7" in kind:
            cores = 2                     # v7x: 2 TensorCores -> prefer >= 2 grid steps
    except Exception:
        pass
    return vmem, cores


def _pick_batch_tile(n, c_in, c_out, hw, hw_big, kt_bytes, vmem_bytes, n_cores):
    """Largest batch tile whose block fits the (generation-aware) VMEM budget.

    Tiles keep the merged-row block shapes (8,128)-legal: either the tile covers the
    whole batch (block == full array) or b_tile*C is a multiple of 8 for both channel
    counts.  On multi-TC chips (v7x) tiles leaving >= n_cores grid steps are preferred
    so both cores get work; on single-TC v5e/v6e the largest fitting tile wins
    (fewer, larger grid steps -> less per-step overhead).
    """
    budget = int(vmem_bytes * 0.6)        # headroom for compiler scratch / spills

    def bytes_needed(bt):
        resident = kt_bytes + 4 * (bt * c_out) * (bt * c_in) + 4 * (bt * c_out) * 8
        blocks = 2 * 4 * bt * (c_in * hw_big + c_out * hw + c_out * hw_big)  # dbl-buffered
        return resident + blocks

    divisors = [d for d in range(1, n + 1) if n % d == 0]
    valid = [d for d in divisors
             if d == n or ((d * c_in) % 8 == 0 and (d * c_out) % 8 == 0)]
    # soft cap: keep the block-diagonal conv weight (and its wasted MXU flops) small
    capped = [d for d in valid if d * max(c_in, c_out) <= 512] or valid
    fits = [d for d in capped if bytes_needed(d) <= budget]
    pool = fits or [min(capped)]          # degrade gracefully if nothing fits
    if n_cores >= 2:
        multi = [d for d in pool if n // d >= n_cores]
        if multi:
            pool = multi
    return max(pool)


# ----------------------------------------------------------------------------
# Wrapper.
# ----------------------------------------------------------------------------
def residual_output_forward(x, estimate_lr, w_model, b_model, wh, ww,
                            scale_lr, offset_lr, scale_hr, offset_hr):
    N, C_in, H, W = x.shape
    N2, C_out, h, w = estimate_lr.shape
    assert N2 == N and wh.shape == (H, h) and ww.shape == (W, w)
    HW, hw = H * W, h * w

    # ---- guard at call time: fold validity requires interpolation rows summing to 1 ----
    rowsum_ok = None
    try:
        rowsum_ok = bool(np.allclose(np.asarray(wh).sum(axis=1), 1.0, atol=1e-5) and
                         np.allclose(np.asarray(ww).sum(axis=1), 1.0, atol=1e-5))
    except Exception:
        rowsum_ok = None      # traced weights: caller must guarantee the property
    if rowsum_ok is False:
        raise ValueError("scaling/bias fold requires interpolation rows summing to 1 "
                         "(integer-scale bicubic, align_corners=False)")

    # ---- per-channel parameter folding (host, tiny) ----
    # TODO(synk): DataScaler assumed per-channel affine (transform: x*s+o, transform_back: (x-o)/s).
    s_lr = jnp.reshape(scale_lr, (-1,)).astype(jnp.float32)
    o_lr = jnp.reshape(offset_lr, (-1,)).astype(jnp.float32)
    s_hr = jnp.reshape(scale_hr, (-1,)).astype(jnp.float32)
    o_hr = jnp.reshape(offset_hr, (-1,)).astype(jnp.float32)
    bias = jnp.reshape(b_model, (-1,)).astype(jnp.float32)
    a_ch = s_hr / s_lr                          # folded scale
    b_ch = (o_hr - o_lr * a_ch) + bias          # folded offset + conv bias

    # Kt[(hi*w + wj), (Hi*W + Wj)] = wh[Hi, hi] * ww[Wj, wj]   (bf16 for the MXU).
    kt = jnp.kron(wh.astype(jnp.float32), ww.astype(jnp.float32)).T.astype(jnp.bfloat16)
    # TODO(synk): switch to the separable two-matmul resize (wh @ e @ ww^T, H-tiled)
    #             once kt exceeds ~4 MiB on v7x / ~16 MiB on v5e/v6e.

    # ---- row-merged, lane-dense layout ----
    x2 = x.reshape(N * C_in, HW).astype(jnp.float32)
    e2 = estimate_lr.reshape(N * C_out, hw).astype(jnp.float32)
    # TODO(synk): x2/wbig could also be cast to bf16 (halves x HBM traffic) if looser
    #             conv precision is acceptable; kept f32 here.

    vmem_bytes, n_cores = _tpu_info()
    kt_bytes = int(kt.size) * kt.dtype.itemsize
    b_tile = _pick_batch_tile(N, C_in, C_out, hw, HW, kt_bytes, vmem_bytes, n_cores)
    R = b_tile * C_out
    K_conv = b_tile * C_in
    grid = (N // b_tile,)

    # Per-row packed params (identical for every block since the channel pattern repeats).
    params = jnp.zeros((R, 8), jnp.float32)
    params = params.at[:, 0].set(jnp.tile(a_ch, b_tile))
    params = params.at[:, 1].set(jnp.tile(b_ch, b_tile))
    # Block-diagonal 1x1-conv weight for the merged-row layout.
    wbig = jnp.kron(jnp.eye(b_tile, dtype=jnp.float32), w_model.astype(jnp.float32))

    block_bytes = 2 * 4 * b_tile * (C_in * HW + C_out * hw + C_out * HW)
    resident_bytes = kt_bytes + 4 * (R * K_conv + R * 8)
    vmem_limit = int(min(0.9 * vmem_bytes,
                         max(2 * resident_bytes + block_bytes + (8 << 20), 32 << 20)))

    cost = pl.CostEstimate(
        flops=int(2 * N * C_out * HW * hw          # resize matmul
                  + 2 * N * C_out * C_in * HW      # 1x1 conv (useful flops)
                  + 2 * N * C_out * hw),           # folded affine
        transcendentals=0,
        bytes_accessed=int(4 * (x2.size + e2.size + N * C_out * HW
                                + wbig.size + params.size) + kt_bytes),
    )

    grid_spec = pltpu.PrefetchScalarGridSpec(
        num_scalar_prefetch=0,
        grid=grid,
        in_specs=[
            pl.BlockSpec((b_tile * C_in, HW), lambda i: (i, 0)),   # x rows of this block
            pl.BlockSpec((R, hw), lambda i: (i, 0)),               # e rows of this block
            pl.BlockSpec((R, K_conv), lambda i: (0, 0)),           # block-diag conv weight
            pl.BlockSpec((R, 8), lambda i: (0, 0)),                # packed per-row params
            pl.BlockSpec((hw, HW), lambda i: (0, 0)),              # bicubic kron matrix (bf16)
        ],
        out_specs=pl.BlockSpec((R, HW), lambda i: (i, 0)),
    )
    out = pl.pallas_call(
        residual_output_kernel,
        out_shape=jax.ShapeDtypeStruct((N * C_out, HW), jnp.float32),
        grid_spec=grid_spec,
        compiler_params=pltpu.CompilerParams(
            dimension_semantics=("parallel",),
            vmem_limit_bytes=vmem_limit),
        cost_estimate=cost,
    )(x2, e2, wbig, params, kt)
    # TODO(synk): bf16 output (out_shape dtype) halves writeback traffic on v7x when
    #             downstream tolerates it.
    return out.reshape(N, C_out, H, W)


# ----------------------------------------------------------------------------
# Pure-JAX reference (original, un-folded math) for verification.
# ----------------------------------------------------------------------------
def reference_forward(x, estimate_lr, w_model, b_model, wh, ww,
                      scale_lr, offset_lr, scale_hr, offset_hr):
    y = jnp.einsum('oc,nchw->nohw', w_model, x) + b_model.reshape(1, -1, 1, 1)
    e = (estimate_lr - offset_lr.reshape(1, -1, 1, 1)) / scale_lr.reshape(1, -1, 1, 1)
    hr = jnp.einsum('Hh,nchw,Ww->ncHW', wh, e, ww)
    hr = hr * scale_hr.reshape(1, -1, 1, 1) + offset_hr.reshape(1, -1, 1, 1)
    return y + hr


if __name__ == "__main__":
    # HR model input x: (N, C_in, H_hr, W_hr); LR estimate: (N, C_out, H_lr, W_lr)
    # with H_hr = 4 * H_lr, W_hr = 3 * W_lr  (scale_factor=(4, 3)).
    N, C_in, C_out = 2, 4, 4
    H_lr, W_lr = 8, 8
    H_hr, W_hr = 4 * H_lr, 3 * W_lr        # 32, 24  ->  H*W = 768 (6 full 128-lane vregs)

    key = jax.random.PRNGKey(0)
    k1, k2, k3 = jax.random.split(key, 3)
    x = jax.random.normal(k1, (N, C_in, H_hr, W_hr), dtype=jnp.float32)
    estimate_lr = jax.random.normal(k2, (N, C_out, H_lr, W_lr), dtype=jnp.float32)

    # Deterministic synthetic parameters (no checkpoint loading).
    w_model = (jax.random.normal(k3, (C_out, C_in), dtype=jnp.float32)
               * (1.0 / np.sqrt(C_in)))
    b_model = 0.01 * jnp.arange(C_out, dtype=jnp.float32)
    scale_lr = 1.0 + 0.1 * jnp.arange(C_out, dtype=jnp.float32)
    offset_lr = 0.05 * jnp.arange(C_out, dtype=jnp.float32)
    scale_hr = 2.0 - 0.1 * jnp.arange(C_out, dtype=jnp.float32)
    offset_hr = -0.03 * jnp.arange(C_out, dtype=jnp.float32)

    # Bicubic interpolation matrices (H scale 4, W scale 3).
    wh = jnp.asarray(bicubic_matrix(H_lr, 4))   # (H_hr, H_lr)
    ww = jnp.asarray(bicubic_matrix(W_lr, 3))   # (W_hr, W_lr)

    out = residual_output_forward(x, estimate_lr, w_model, b_model, wh, ww,
                                  scale_lr, offset_lr, scale_hr, offset_hr)
    out = jax.block_until_ready(out)

    ref = reference_forward(x, estimate_lr, w_model, b_model, wh, ww,
                            scale_lr, offset_lr, scale_hr, offset_hr)
    # Resize-matmul operands are bf16 (f32 accumulation); compare against the fp32
    # reference with bf16-appropriate tolerances.
    np.testing.assert_allclose(np.asarray(out), np.asarray(ref),
                               rtol=5e-2, atol=5e-2)
    print("KERNEL_OK")
</pallas_src>

<mosaic_0001>
module attributes {stable_mosaic.version = 11 : i64} {
  func.func @residual_output_kernel(%arg0: i32, %arg1: memref<8x768xf32, #tpu.memory_space<vmem>>, %arg2: memref<8x64xf32, #tpu.memory_space<vmem>>, %arg3: memref<8x8xf32, #tpu.memory_space<vmem>>, %arg4: memref<8x8xf32, #tpu.memory_space<vmem>>, %arg5: memref<64x768xbf16, #tpu.memory_space<vmem>>, %arg6: memref<8x768xf32, #tpu.memory_space<vmem>>) attributes {dimension_semantics = [#tpu.dimension_semantics<parallel>], iteration_bounds = array<i64: 1>, scalar_prefetch = 0 : i64, scratch_operands = 0 : i64, tpu.core_type = #tpu.core_type<tc>, window_params = [{transform_indices = @transform_0, window_bounds = array<i64: 8, 768>}, {transform_indices = @transform_1, window_bounds = array<i64: 8, 64>}, {pipeline_mode = #tpu.pipeline_mode<synchronous>, transform_indices = @transform_2, window_bounds = array<i64: 8, 8>}, {pipeline_mode = #tpu.pipeline_mode<synchronous>, transform_indices = @transform_3, window_bounds = array<i64: 8, 8>}, {pipeline_mode = #tpu.pipeline_mode<synchronous>, transform_indices = @transform_4, window_bounds = array<i64: 64, 768>}, {transform_indices = @transform_5, window_bounds = array<i64: 8, 768>}]} {
    %c0 = arith.constant 0 : index
    %c0_0 = arith.constant 0 : index
    %0 = vector.load %arg4[%c0, %c0_0] : memref<8x8xf32, #tpu.memory_space<vmem>>, vector<8x8xf32>
    %1 = vector.extract_strided_slice %0 {offsets = [0, 0], sizes = [8, 1], strides = [1, 1]} : vector<8x8xf32> to vector<8x1xf32>
    %2 = vector.extract_strided_slice %0 {offsets = [0, 1], sizes = [8, 1], strides = [1, 1]} : vector<8x8xf32> to vector<8x1xf32>
    %c0_1 = arith.constant 0 : index
    %c0_2 = arith.constant 0 : index
    %3 = vector.load %arg2[%c0_1, %c0_2] : memref<8x64xf32, #tpu.memory_space<vmem>>, vector<8x64xf32>
    %4 = vector.broadcast %1 : vector<8x1xf32> to vector<8x64xf32>
    %5 = arith.mulf %3, %4 : vector<8x64xf32>
    %6 = vector.broadcast %2 : vector<8x1xf32> to vector<8x64xf32>
    %7 = arith.addf %5, %6 : vector<8x64xf32>
    %8 = arith.truncf %7 : vector<8x64xf32> to vector<8x64xbf16>
    %c0_3 = arith.constant 0 : index
    %c0_4 = arith.constant 0 : index
    %9 = vector.load %arg5[%c0_3, %c0_4] : memref<64x768xbf16, #tpu.memory_space<vmem>>, vector<64x768xbf16>
    %cst = arith.constant dense<0.000000e+00> : vector<8x768xf32>
    %10 = tpu.matmul %8, %9, %cst {dimension_numbers = #tpu.dot_dimension_numbers<[1], [0], [0], [1], [0, 0, 1, 1], [], []>} : vector<8x64xbf16>, vector<64x768xbf16>, vector<8x768xf32> -> vector<8x768xf32>
    %c0_5 = arith.constant 0 : index
    %c0_6 = arith.constant 0 : index
    %11 = vector.load %arg3[%c0_5, %c0_6] : memref<8x8xf32, #tpu.memory_space<vmem>>, vector<8x8xf32>
    %c0_7 = arith.constant 0 : index
    %c0_8 = arith.constant 0 : index
    %12 = vector.load %arg1[%c0_7, %c0_8] : memref<8x768xf32, #tpu.memory_space<vmem>>, vector<8x768xf32>
    %cst_9 = arith.constant dense<0.000000e+00> : vector<8x768xf32>
    %13 = tpu.matmul %11, %12, %cst_9 {dimension_numbers = #tpu.dot_dimension_numbers<[1], [0], [0], [1], [0, 0, 1, 1], [], []>} : vector<8x8xf32>, vector<8x768xf32>, vector<8x768xf32> -> vector<8x768xf32>
    %14 = arith.addf %10, %13 : vector<8x768xf32>
    %c0_10 = arith.constant 0 : index
    %c0_11 = arith.constant 0 : index
    %15 = vector.load %arg6[%c0_10, %c0_11] : memref<8x768xf32, #tpu.memory_space<vmem>>, vector<8x768xf32>
    tpu.vector_store %arg6[%c0_10, %c0_11], %14 {strides = array<i32>} : memref<8x768xf32, #tpu.memory_space<vmem>>, vector<8x768xf32>,
    return
  }
  func.func @transform_0(%arg0: i32) -> (i32, i32) {
    %c0_i32 = arith.constant 0 : i32
    %c0_i32_0 = arith.constant 0 : i32
    return %arg0, %c0_i32 : i32, i32
  }
  func.func @transform_1(%arg0: i32) -> (i32, i32) {
    %c0_i32 = arith.constant 0 : i32
    %c0_i32_0 = arith.constant 0 : i32
    return %arg0, %c0_i32 : i32, i32
  }
  func.func @transform_2(%arg0: i32) -> (i32, i32) {
    %c0_i32 = arith.constant 0 : i32
    %c0_i32_0 = arith.constant 0 : i32
    %c0_i32_1 = arith.constant 0 : i32
    return %c0_i32, %c0_i32_0 : i32, i32
  }
  func.func @transform_3(%arg0: i32) -> (i32, i32) {
    %c0_i32 = arith.constant 0 : i32
    %c0_i32_0 = arith.constant 0 : i32
    %c0_i32_1 = arith.constant 0 : i32
    return %c0_i32, %c0_i32_0 : i32, i32
  }
  func.func @transform_4(%arg0: i32) -> (i32, i32) {
    %c0_i32 = arith.constant 0 : i32
    %c0_i32_0 = arith.constant 0 : i32
    %c0_i32_1 = arith.constant 0 : i32
    return %c0_i32, %c0_i32_0 : i32, i32
  }
  func.func @transform_5(%arg0: i32) -> (i32, i32) {
    %c0_i32 = arith.constant 0 : i32
    %c0_i32_0 = arith.constant 0 : i32
    return %arg0, %c0_i32 : i32, i32
  }
}

</mosaic_0001>

<bundles_post_ra>
// kernel: tpu_custom_call.1
= control target key start
LH: loop header
LB: loop body
LE: loop exit
PB: predicated region body
PF: predicated region fallthrough
CT: control target
= control target key end

     0   :  { %10 = vsyncpa [#allocation3], 0  ;;  %s848_s0 = inlined_call_operand.hbm [shape: f32[8,768], index: 0, kind: input, shape index: {}]   ;;  %s849_s1 = inlined_call_operand.hbm [shape: f32[8,64], index: 1, kind: input, shape index: {}]   ;;  %s850_s2 = inlined_call_operand.hbm [shape: f32[8,8], index: 2, kind: input, shape index: {}]   ;;  %s851_s3 = inlined_call_operand.hbm [shape: f32[8,8], index: 3, kind: input, shape index: {}]   ;;  %s852_s4 = inlined_call_operand.hbm [shape: bf16[64,768], index: 4, kind: input, shape index: {}]   ;;  %s853_s5 = inlined_call_operand.hbm [shape: f32[8,768], index: 5, kind: output, shape index: {}]  }
   0x1   :  { %11 = vsyncpa [#allocation6], 0 }
   0x2   :  { %12 = vsyncpa [#allocation9], 0  ;;  %s30_s20 = sshll.u32 %s849_s1, 4  ;;  %s31_s20 = int_to_ptr.hbm [resolvable:$true] %s30_s20 }
   0x3   :  { %13 = vsyncpa [#allocation4], 0  ;;  %s784_s21 = smov [#allocation5]   ;;  %s52_s25 = sshll.u32 %s851_s3, 4  ;;  %s53_s25 = int_to_ptr.hbm [resolvable:$true] %s52_s25 }
   0x4   :  { %s32_s22 = sshll.u32 %s784_s21, 4  ;;  %s785_s26 = smov [#allocation8]   ;;  %s33_s22 = int_to_ptr.vmem [resolvable:$true] %s32_s22 }
   0x5   :  { %35 = dma.hbm_to_vmem [thread:$0]  %s31_s20, 128, %s33_s22, [#allocation6]  }
   0x6   :  { %s54_s27 = sshll.u32 %s785_s26, 4  ;;  %s19_s30 = sshll.u32 %s848_s0, 4  ;;  %s55_s27 = int_to_ptr.vmem [resolvable:$true] %s54_s27  ;;  %s20_s30 = int_to_ptr.hbm [resolvable:$true] %s19_s30 }
   0x7   :  { %57 = dma.hbm_to_vmem [thread:$0]  %s53_s25, 128, %s55_s27, [#allocation9]  }
   0x8   :  { %s41_s7 = sshll.u32 %s850_s2, 4  ;;  %s786_s8 = smov [#allocation2]   ;;  %s42_s7 = int_to_ptr.hbm [resolvable:$true] %s41_s7 }
   0x9   :  { %s21_s9 = sshll.u32 %s786_s8, 4  ;;  %s787_s3 = smov [#allocation7]   ;;  %s22_s9 = int_to_ptr.vmem [resolvable:$true] %s21_s9 }
   0xa   :  { %24 = dma.hbm_to_vmem [thread:$0]  %s20_s30, 768, %s22_s9, [#allocation3]  }
   0xb   :  { %s43_s10 = sshll.u32 %s787_s3, 4  ;;  %s62_s13 = sshll.u32 %s852_s4, 4  ;;  %s44_s10 = int_to_ptr.vmem [resolvable:$true] %s43_s10  ;;  %s63_s13 = int_to_ptr.hbm [resolvable:$true] %s62_s13 }
   0xc   :  { %46 = dma.hbm_to_vmem [thread:$0]  %s42_s7, 128, %s44_s10, [#allocation6]  }
   0xd   :  { %s788_s0 = smov [#allocation10]   ;;  %s789_s15 = smov 384  }
   0xe   :  { %s64_s14 = sshll.u32 %s788_s0, 4  ;;  %s790_s16 = smov 24   ;;  %s65_s14 = int_to_ptr.vmem [resolvable:$true] %s64_s14 }
   0xf   :  { %70 = dma.hbm_to_vmem [thread:$0]  %s63_s13, 3072, %s65_s14, [#allocation9], %s789_s15, %s789_s15, %s790_s16  }
  0x10   :  { %776 = dma.done.wait [#allocation3], 768  }
  0x11   :  { %777 = vsyncadd [#allocation3], 4294966528 }
  0x12   :  { %778 = dma.done.wait [#allocation6], 256  }
  0x13   :  { %779 = vsyncadd [#allocation6], 4294967040 }
  0x14   :  { %780 = dma.done.wait [#allocation9], 3200  }
  0x15   :  { %781 = vsyncadd [#allocation9], 4294964096  ;;  %v791_v0 = vmov 0   ;;  %vm137_vm0 = vcmask 64512   ;;  %v92_v1 = vld [vmem:[#allocation8] sm:$0xff]  ;;  %v132_v3 = vld [vmem:[#allocation2 + $0x8] sm:$0xff] }
  0x16   :  { %630 = vset.pattern.permute.xlu0 %v791_v0  ;;  %v131_v2 = vld [vmem:[#allocation2] sm:$0xff]  ;;  %v130_v4 = vld [vmem:[#allocation7] sm:$0xff]  ;;  %v133_v5 = vld [vmem:[#allocation2 + $0x10] sm:$0xff]  ;;  %176 = vmatpush.msra.mxu1 %v132_v3  ;;  %v792_v21 = vmov 1   ;;  %vm381_vm1 = vcmask 523264   ;;  %s793_s2 = smov [#allocation11]  }
  0x17   :  { %96 = vperm.xlu0 %630, %v92_v1   ;;  %156 = vmatpush.msra.mxu0 %v131_v2  ;;  %v134_v6 = vld [vmem:[#allocation2 + $0x18] sm:$0xff]  ;;  %v135_v7 = vld [vmem:[#allocation2 + $0x20] sm:$0xff]  ;;  %v136_v8 = vld [vmem:[#allocation2 + $0x28] sm:$0xff]  ;;  %s474_s4 = sshll.u32 %s793_s2, 4  ;;  %s476_s19 = sshll.u32 %s853_s5, 4  ;;  %s475_s4 = int_to_ptr.vmem [resolvable:$true] %s474_s4  ;;  %s477_s19 = int_to_ptr.hbm [resolvable:$true] %s476_s19 }
  0x18   :  { %488 = vmatmul.msk.f32.vlgmr.msra.gmra.mxu0 %vm137_vm0, %v130_v4  ;;  %v568_v9 = vld [vmem:[#allocation10 + $0x90] sm:$0xf]  ;;  %489 = vmatmul.msk.f32.vlgmr.msra.gmra.mxu1 %vm137_vm0, %v130_v4  ;;  %v617_v10 = vld [vmem:[#allocation10 + $0xa4] sm:$0xf0]  ;;  %v614_v11 = vld [vmem:[#allocation10 + $0x94] sm:$0xf] }
  0x19   :  { %196 = vmatpush.msra.mxu2 %v133_v5  ;;  %v570_v12 = vld [vmem:[#allocation10 + $0xa8] sm:$0xf0]  ;;  %216 = vmatpush.msra.mxu3 %v134_v6  ;;  %v569_v13 = vor.u32 %v617_v10, %v568_v9  ;;  %v576_v15 = vld [vmem:[#allocation10 + $0x98] sm:$0xf]  ;;  %v618_v16 = vld [vmem:[#allocation10 + $0xac] sm:$0xf0] }
  0x1a   :  { %236 = vmatpush.msrb.mxu0 %v135_v7  ;;  %v573_v14 = vor.u32 %v614_v11, %v570_v12  ;;  %v615_v17 = vld [vmem:[#allocation10 + $0x9c] sm:$0xf]  ;;  %256 = vmatpush.msrb.mxu1 %v136_v8  ;;  %v577_v18 = vor.u32 %v618_v16, %v576_v15  ;;  %v578_v19 = vld [vmem:[#allocation10 + $0xb0] sm:$0xf0]  ;;  %v544_v22 = vld [vmem:[#allocation10 + $0x60] sm:$0xf] }
  0x1b   :  { %490 = vmatmul.msk.f32.vlgmr.msra.gmra.mxu2 %vm137_vm0, %v130_v4  ;;  %v581_v20 = vor.u32 %v615_v17, %v578_v19  ;;  %491 = vmatmul.msk.f32.vlgmr.msra.gmra.mxu3 %vm137_vm0, %v130_v4  ;;  %v611_v23 = vld [vmem:[#allocation10 + $0x74] sm:$0xf0]  ;;  %v608_v24 = vld [vmem:[#allocation10 + $0x64] sm:$0xf]  ;;  %v546_v26 = vld [vmem:[#allocation10 + $0x78] sm:$0xf0] }
  0x1c   :  { %389 = vmatpush.bf16.msrb.mxu2 %v569_v13  ;;  %402 = vmatpush.bf16.msrb.mxu3 %v573_v14  ;;  %v545_v25 = vor.u32 %v611_v23, %v544_v22  ;;  %v552_v27 = vld [vmem:[#allocation10 + $0x68] sm:$0xf]  ;;  %v612_v28 = vld [vmem:[#allocation10 + $0x7c] sm:$0xf0]  ;;  %v549_v29 = vor.u32 %v608_v24, %v546_v26  ;;  %v609_v31 = vld [vmem:[#allocation10 + $0x6c] sm:$0xf] }
  0x1d   :  { %415 = vmatpush.bf16.msra.mxu0 %v577_v18  ;;  %428 = vmatpush.bf16.msra.mxu1 %v581_v20  ;;  %v553_v30 = vor.u32 %v612_v28, %v552_v27  ;;  %v554_v32 = vld [vmem:[#allocation10 + $0x80] sm:$0xf0]  ;;  %v520_v33 = vld [vmem:[#allocation10 + $0x30] sm:$0xf]  ;;  %v605_v35 = vld [vmem:[#allocation10 + $0x44] sm:$0xf0] }
  0x1e   :  { %v557_v34 = vor.u32 %v609_v31, %v554_v32  ;;  %v602_v36 = vld [vmem:[#allocation10 + $0x34] sm:$0xf]  ;;  %v522_v37 = vld [vmem:[#allocation10 + $0x48] sm:$0xf0]  ;;  %v521_v38 = vor.u32 %v605_v35, %v520_v33  ;;  %v528_v40 = vld [vmem:[#allocation10 + $0x38] sm:$0xf] }
  0x1f   :  { %631 = vset.pattern.permute.xlu0 %v792_v21  ;;  %v525_v39 = vor.u32 %v602_v36, %v522_v37  ;;  %v606_v41 = vld [vmem:[#allocation10 + $0x4c] sm:$0xf0]  ;;  %v603_v42 = vld [vmem:[#allocation10 + $0x3c] sm:$0xf]  ;;  %v530_v44 = vld [vmem:[#allocation10 + $0x50] sm:$0xf0] }
  0x20   :  { %101 = vperm.xlu0 %631, %v92_v1   ;;  %492 = vmatmul.msk.f32.vlgmr.msrb.gmra.mxu0 %vm137_vm0, %v130_v4  ;;  %v529_v43 = vor.u32 %v606_v41, %v528_v40  ;;  %v533_v45 = vor.u32 %v603_v42, %v530_v44  ;;  %v496_v46 = vld [vmem:[#allocation10] sm:$0xf]  ;;  %v599_v47 = vld [vmem:[#allocation10 + $0x14] sm:$0xf0]  ;;  %v596_v48 = vld [vmem:[#allocation10 + $0x4] sm:$0xf] }
  0x21   :  { %493 = vmatmul.msk.f32.vlgmr.msrb.gmra.mxu1 %vm137_vm0, %v130_v4  ;;  %390 = vmatpush.bf16.msrb.mxu2 %v545_v25  ;;  %v497_v49 = vor.u32 %v599_v47, %v496_v46  ;;  %v498_v50 = vld [vmem:[#allocation10 + $0x18] sm:$0xf0]  ;;  %v504_v51 = vld [vmem:[#allocation10 + $0x8] sm:$0xf]  ;;  %v600_v52 = vld [vmem:[#allocation10 + $0x1c] sm:$0xf0] }
  0x22   :  { %403 = vmatpush.bf16.msrb.mxu3 %v549_v29  ;;  %416 = vmatpush.bf16.msra.mxu0 %v553_v30  ;;  %v501_v53 = vor.u32 %v596_v48, %v498_v50  ;;  %v505_v54 = vor.u32 %v600_v52, %v504_v51  ;;  %v597_v55 = vld [vmem:[#allocation10 + $0xc] sm:$0xf]  ;;  %v506_v56 = vld [vmem:[#allocation10 + $0x20] sm:$0xf0]  ;;  %v584_v58 = vld [vmem:[#allocation10 + $0xa0] sm:$0xf] }
  0x23   :  { %429 = vmatpush.bf16.msra.mxu1 %v557_v34  ;;  %v509_v57 = vor.u32 %v597_v55, %v506_v56  ;;  %v619_v59 = vld [vmem:[#allocation10 + $0xb4] sm:$0xf0]  ;;  %v616_v60 = vld [vmem:[#allocation10 + $0xa4] sm:$0xf]  ;;  %v586_v62 = vld [vmem:[#allocation10 + $0xb8] sm:$0xf0] }
  0x24   :  { %v585_v61 = vor.u32 %v619_v59, %v584_v58  ;;  %v589_v63 = vor.u32 %v616_v60, %v586_v62  ;;  %v560_v0 = vld [vmem:[#allocation10 + $0x70] sm:$0xf]  ;;  %v613_v1 = vld [vmem:[#allocation10 + $0x84] sm:$0xf0]  ;;  %v610_v2 = vld [vmem:[#allocation10 + $0x74] sm:$0xf] }
  0x25   :  { %391 = vmatpush.bf16.msrb.mxu2 %v521_v38  ;;  %v561_v3 = vor.u32 %v613_v1, %v560_v0  ;;  %v562_v4 = vld [vmem:[#allocation10 + $0x88] sm:$0xf0]  ;;  %v536_v6 = vld [vmem:[#allocation10 + $0x40] sm:$0xf]  ;;  %v607_v7 = vld [vmem:[#allocation10 + $0x54] sm:$0xf0] }
  0x26   :  { %404 = vmatpush.bf16.msrb.mxu3 %v525_v39  ;;  %417 = vmatpush.bf16.msra.mxu0 %v529_v43  ;;  %v565_v5 = vor.u32 %v610_v2, %v562_v4  ;;  %v604_v8 = vld [vmem:[#allocation10 + $0x44] sm:$0xf]  ;;  %v538_v9 = vld [vmem:[#allocation10 + $0x58] sm:$0xf0]  ;;  %v537_v10 = vor.u32 %v607_v7, %v536_v6  ;;  %v512_v12 = vld [vmem:[#allocation10 + $0x10] sm:$0xf] }
  0x27   :  { %430 = vmatpush.bf16.msra.mxu1 %v533_v45  ;;  %v541_v11 = vor.u32 %v604_v8, %v538_v9  ;;  %v601_v13 = vld [vmem:[#allocation10 + $0x24] sm:$0xf0]  ;;  %v598_v14 = vld [vmem:[#allocation10 + $0x14] sm:$0xf]  ;;  %v514_v15 = vld [vmem:[#allocation10 + $0x28] sm:$0xf0] }
  0x28   :  { %v513_v16 = vor.u32 %v601_v13, %v512_v12  ;;  %v517_v17 = vor.u32 %v598_v14, %v514_v15  ;;  %v93_v19 = vld [vmem:[#allocation5] sm:$0xff] }
  0x29   :  { %392 = vmatpush.bf16.msrb.mxu2 %v497_v49 }
  0x2a   :  { %405 = vmatpush.bf16.msrb.mxu3 %v501_v53  ;;  %418 = vmatpush.bf16.msra.mxu0 %v505_v54 }
  0x2b   :  { %431 = vmatpush.bf16.msra.mxu1 %v509_v57 }
  0x2d   :  { %441 = vmatpush.bf16.msra.mxu2 %v585_v61 }
  0x2e   :  { %454 = vmatpush.bf16.msra.mxu3 %v589_v63 }
  0x31   :  { %442 = vmatpush.bf16.msra.mxu2 %v561_v3 }
  0x32   :  { %455 = vmatpush.bf16.msra.mxu3 %v565_v5 }
  0x35   :  { %443 = vmatpush.bf16.msra.mxu2 %v537_v10 }
  0x36   :  { %456 = vmatpush.bf16.msra.mxu3 %v541_v11 }
  0x39   :  { %444 = vmatpush.bf16.msra.mxu2 %v513_v16 }
  0x3a   :  { %457 = vmatpush.bf16.msra.mxu3 %v517_v17 }
  0x89   :  { %v97_v18 = vpop.permute.xlu0 %96 }
  0x8a   :  { %v99_v20 = vmul.f32 %v97_v18, %v93_v19 }
  0x92   :  { %v102_v21 = vpop.permute.xlu0 %101 }
  0x93   :  { %v104_v22 = vadd.f32 %v102_v21, %v99_v20 }
  0x95   :  { %v105_v23 = vpack.c.bf16 %v104_v22, %v104_v22  ;;  %v158_v24 = vpop.f32.mrf.mxu0  ;;  %v178_v25 = vpop.f32.mrf.mxu1 }
  0x97   :  { %590 = vmatmul.msk.bf16.vlgmr.msrb.gmra.mxu2 %vm381_vm1, %v105_v23  ;;  %591 = vmatmul.msk.bf16.vlgmr.msrb.gmra.mxu3 %vm381_vm1, %v105_v23 }
  0x98   :  { %592 = vmatmul.msk.bf16.vlgmr.msra.gmra.mxu0 %vm381_vm1, %v105_v23  ;;  %593 = vmatmul.msk.bf16.vlgmr.msra.gmra.mxu1 %vm381_vm1, %v105_v23 }
  0x9d   :  { %v238_v26 = vpop.f32.mrf.mxu0 }
  0x9e   :  { %v258_v27 = vpop.f32.mrf.mxu1  ;;  %v198_v28 = vpop.f32.mrf.mxu2 }
  0x9f   :  { %v218_v29 = vpop.f32.mrf.mxu3 }
  0xa7   :  { %594 = vmatmul.msk.bf16.vlgmr.msra.gmra.mxu2 %vm381_vm1, %v105_v23  ;;  %595 = vmatmul.msk.bf16.vlgmr.msra.gmra.mxu3 %vm381_vm1, %v105_v23 }
 0x115   :  { %v420_v30 = vpop.f32.mrf.mxu0  ;;  %v433_v31 = vpop.f32.mrf.mxu1 }
 0x116   :  { %v421_v32 = vadd.f32 %v420_v30, %v198_v28  ;;  %v434_v33 = vadd.f32 %v433_v31, %v218_v29 }
 0x118   :  { %465 = vst [vmem:[#allocation11 + $0x10] sm:$0xff] %v421_v32 }
 0x119   :  { %466 = vst [vmem:[#allocation11 + $0x18] sm:$0xff] %v434_v33 }
 0x11a   :  { %v394_v34 = vpop.f32.mrf.mxu2  ;;  %v407_v35 = vpop.f32.mrf.mxu3 }
 0x11b   :  { %v395_v36 = vadd.f32 %v394_v34, %v158_v24  ;;  %v408_v37 = vadd.f32 %v407_v35, %v178_v25 }
 0x11d   :  { %463 = vst [vmem:[#allocation11] sm:$0xff] %v395_v36  ;;  %v422_v38 = vpop.f32.mrf.mxu0  ;;  %v435_v39 = vpop.f32.mrf.mxu1 }
 0x11e   :  { %464 = vst [vmem:[#allocation11 + $0x8] sm:$0xff] %v408_v37 }
 0x122   :  { %v396_v40 = vpop.f32.mrf.mxu2  ;;  %v409_v41 = vpop.f32.mrf.mxu3 }
 0x12a   :  { %v446_v42 = vpop.f32.mrf.mxu2  ;;  %v459_v43 = vpop.f32.mrf.mxu3 }
 0x12b   :  { %v447_v44 = vadd.f32 %v446_v42, %v238_v26  ;;  %v460_v45 = vadd.f32 %v459_v43, %v258_v27 }
 0x12d   :  { %467 = vst [vmem:[#allocation11 + $0x20] sm:$0xff] %v447_v44 }
 0x12e   :  { %468 = vst [vmem:[#allocation11 + $0x28] sm:$0xff] %v460_v45 }
 0x12f   :  { %479 = dma.vmem_to_hbm [thread:$0]  %s475_s4, 768, %s477_s19, [#allocation4]  }
 0x132   :  { %v448_v46 = vpop.f32.mrf.mxu2  ;;  %v461_v47 = vpop.f32.mrf.mxu3 }
 0x133   :  { %782 = dma.done.wait [#allocation4], 768  }
 0x134   :  { %783 = vsyncadd [#allocation4], 4294966528 }
 0x135   :  { %484 = vsyncpa [#allocation3], 1 }
 0x136   :  { %485 = vsyncpa [#allocation6], 1 }
 0x137   :  { %486 = vsyncpa [#allocation9], 1 }
 0x138   :  { %487 = vsyncpa [#allocation4], 1 }

</bundles_post_ra>
